<compile_context>
chip_gen: v5e
topology: v5e:2x2
jax: 0.10.0
libtpu: 0.0.40
codegen_flags: <defaults>
</compile_context>

<pallas_src>
import functools

import jax
import jax.numpy as jnp
from jax import lax
from jax.experimental import pallas as pl
from jax.experimental.pallas import tpu as pltpu


# ----------------------------------------------------------------------------
# Pallas kernel: one group of G lane-packed batch pairs per grid step.
# ----------------------------------------------------------------------------
def resblock_kernel(xp_ref, w1_ref, b1_ref, w2_ref, b2_ref, out_ref, y1_ref,
                    *, H, G):
    # xp_ref : (1, G*(H+2), K)   input slab, f32.  Image g occupies rows
    #                            g*(H+2) .. g*(H+2)+H+1 with zero halo rows at
    #                            both ends; lanes = P packed images x (W, C).
    # w1_ref : (3, K, K1)        conv1 band weights, bf16 (BN1 scale folded,
    #                            SAME width-padding folded into the band).
    # b1_ref : (1, K1)           BN1 bias, f32.
    # w2_ref : (3, K1, K2)       conv2 band weights, bf16 (BN2 scale folded).
    # b2_ref : (1, K2)           BN2 bias, f32.
    # out_ref: (1, G*H, K2)      output, lane-dense (128), junk rows skipped.
    # y1_ref : VMEM (G*(H+2), K1) f32 scratch -- conv1 output slab with zero
    #                            halo rows (consumed by conv2).
    Mtot = G * (H + 2)
    M = Mtot - 2                       # rows of conv output computed at once

    xp = xp_ref[0]                     # (Mtot, K) f32

    # ---- conv1 (3x3, SAME) + BN1 + ReLU: 3 full-width bf16 MXU matmuls.
    acc1 = jnp.dot(xp[0:M, :].astype(jnp.bfloat16), w1_ref[0],
                   preferred_element_type=jnp.float32)
    for dh in (1, 2):
        acc1 += jnp.dot(xp[dh:dh + M, :].astype(jnp.bfloat16), w1_ref[dh],
                        preferred_element_type=jnp.float32)
    y1 = jnp.maximum(acc1 + b1_ref[...], 0.0)          # f32 epilogue

    if G > 1:
        # Zero the junk rows where the vertical stacking makes the conv bleed
        # across image boundaries: acc row m corresponds to slab row m+1, and
        # only rows inside an image's interior band are valid.
        r = lax.broadcasted_iota(jnp.int32, y1.shape, 0)
        valid = r < 0                                    # all False
        for g in range(G):
            lo = g * (H + 2)
            valid = jnp.logical_or(
                valid, jnp.logical_and(r >= lo, r < lo + H))
        y1 = jnp.where(valid, y1, 0.0)

    # Build the conv1 output slab with zero halo rows.  The two outermost halo
    # rows are re-zeroed every step (not gated on program_id == 0): with
    # "parallel" dimension semantics each TensorCore gets its own scratch and
    # may never see program_id 0, and the cost is two 1x128 stores.
    zrow = jnp.zeros((1, y1_ref.shape[1]), jnp.float32)
    y1_ref[0:1, :] = zrow
    y1_ref[Mtot - 1:Mtot, :] = zrow
    y1_ref[1:1 + M, :] = y1

    # ---- conv2 (3x3, SAME) + BN2 (no act).
    acc2 = jnp.dot(y1_ref[0:M, :].astype(jnp.bfloat16), w2_ref[0],
                   preferred_element_type=jnp.float32)
    for dh in (1, 2):
        acc2 += jnp.dot(y1_ref[dh:dh + M, :].astype(jnp.bfloat16), w2_ref[dh],
                        preferred_element_type=jnp.float32)

    # ---- residual add (idconv = noop, pool = noop) + final ReLU.
    # Residual = interior rows of the input slab (acc row m <-> slab row m+1);
    # C == Co so the lane layouts match exactly.  Kept in f32.
    out_full = jnp.maximum(acc2 + b2_ref[...] + xp[1:1 + M, :], 0.0)

    # Write only each image's H valid rows (skip the junk boundary rows).
    for g in range(G):
        src = g * (H + 2)
        out_ref[0, g * H:(g + 1) * H, :] = (
            out_full[src:src + H, :].astype(out_ref.dtype))


# ----------------------------------------------------------------------------
# One-time prep: BN fold + band-weight construction (hoisted out of the
# per-call path; run once per weight set and cache).
# ----------------------------------------------------------------------------
def _band_weights(w_hwio, scale, W):
    """(3,3,Ci,Co) conv weights -> (3, W*Ci, W*Co) band matrices.

    The dw kernel offset is folded into the contraction dim, so the conv is
        out[h] = sum_dh slab[h-1+dh, :] @ band[dh]
    with an *unpadded-width* slab: SAME zero padding along W is encoded by the
    selection matrix (out-of-range input columns simply select nothing).
    The BN scale is folded into the output channels.
    """
    kh, kw, ci, co = w_hwio.shape
    ws = w_hwio * scale[None, None, None, :]
    w_in = jnp.arange(W)[None, :, None]
    dw = jnp.arange(kw)[:, None, None]
    w_out = jnp.arange(W)[None, None, :]
    sel = (w_in == w_out + dw - 1).astype(ws.dtype)      # (kw, W_in, W_out)
    band = jnp.einsum("hwio,wab->haibo", ws, sel)        # (kh, W, ci, W, co)
    return band.reshape(kh, W * ci, W * co)


def _pack_pairs(band, P):
    """Block-diagonal replication over the P batch elements packed on lanes."""
    kh, a, b = band.shape
    eye = jnp.eye(P, dtype=band.dtype)
    return jnp.einsum("pq,hab->hpaqb", eye, band).reshape(kh, P * a, P * b)


def _tile_bias(bias, W, P):
    return jnp.tile(jnp.tile(bias, W), P)[None, :]       # (1, P*W*C)


def prepare_resblock(params, W, eps=1e-5, pack=2):
    """Fold eval-mode BN into band weights / biases.  Run once per weight set."""
    w1 = jnp.transpose(params["w1"], (2, 3, 1, 0))       # OIHW -> HWIO
    w2 = jnp.transpose(params["w2"], (2, 3, 1, 0))
    s1 = params["g1"] / jnp.sqrt(params["v1"] + eps)
    b1 = params["b1"] - params["m1"] * s1
    s2 = params["g2"] / jnp.sqrt(params["v2"] + eps)
    b2 = params["b2"] - params["m2"] * s2
    return {
        # bf16 storage: MXU is bf16-native on v5e/v6e/v7x; accumulation is f32.
        "w1b": _pack_pairs(_band_weights(w1, s1, W), pack).astype(jnp.bfloat16),
        "b1t": _tile_bias(b1, W, pack),                  # f32
        "w2b": _pack_pairs(_band_weights(w2, s2, W), pack).astype(jnp.bfloat16),
        "b2t": _tile_bias(b2, W, pack),                  # f32
    }


def _choose_group(nb_pairs, H, target_rows=144):
    """How many lane-packed pairs to stack vertically per grid step.

    Targets M = G*(H+2)-2 near 128 (amortize MXU fill/drain and the ~0.35 us
    per-step overhead) while keeping >= 2 grid steps whenever the batch allows
    it, so v7x's second TensorCore gets work.
    """
    g_cap = max(1, target_rows // (H + 2))
    divs = [g for g in range(1, nb_pairs + 1)
            if nb_pairs % g == 0 and g <= g_cap]
    multi = [g for g in divs if nb_pairs // g >= 2]
    return max(multi) if multi else max(divs)


# ----------------------------------------------------------------------------
# Per-call wrapper: layout packing + pallas_call.
# ----------------------------------------------------------------------------
def resblock_forward(x_nchw, prepped, pack=2):
    N, C, H, W = x_nchw.shape
    P = pack
    assert N % P == 0, "batch must be a multiple of the lane-packing factor"
    nb_pairs = N // P
    K = P * W * C
    K1 = prepped["w1b"].shape[2]
    K2 = prepped["w2b"].shape[2]
    assert prepped["w1b"].shape[1] == K
    Co = K2 // (P * W)
    assert Co == C, "identity shortcut requires ni == nf"

    G = _choose_group(nb_pairs, H)
    NB = nb_pairs // G
    Mtot = G * (H + 2)

    # Pack P images side-by-side along lanes, stack G pairs along sublanes,
    # each image with its own two zero height-halo rows.  No width padding
    # (SAME padding along W lives in the band weights); no sublane over-pad
    # (block dim == full array dim satisfies the (8,128) rule).
    x = jnp.transpose(x_nchw, (0, 2, 3, 1))                          # NHWC
    xg = x.reshape(NB, G, P, H, W, C).transpose(0, 1, 3, 2, 4, 5)    # NB,G,H,P,W,C
    xg = xg.reshape(NB, G, H, K)
    xg = jnp.pad(xg, ((0, 0), (0, 0), (1, 1), (0, 0)))               # halo rows
    xp = xg.reshape(NB, Mtot, K)
    # TODO(synk): xp could be stored in bf16 to halve input DMA; kept f32 so
    #             the residual add stays f32 (v5e epilogue) and the dh-offset
    #             sublane slices stay on a 32-bit layout.

    kern = functools.partial(resblock_kernel, H=H, G=G)
    out = pl.pallas_call(
        kern,
        out_shape=jax.ShapeDtypeStruct((NB, G * H, K2), x.dtype),
        grid_spec=pltpu.PrefetchScalarGridSpec(
            num_scalar_prefetch=0,
            grid=(NB,),
            in_specs=[
                pl.BlockSpec((1, Mtot, K), lambda n: (n, 0, 0)),
                # constant-index weight/bias blocks stay VMEM-resident
                pl.BlockSpec((3, K, K1), lambda n: (0, 0, 0)),
                pl.BlockSpec((1, K1), lambda n: (0, 0)),
                pl.BlockSpec((3, K1, K2), lambda n: (0, 0, 0)),
                pl.BlockSpec((1, K2), lambda n: (0, 0)),
            ],
            out_specs=pl.BlockSpec((1, G * H, K2), lambda n: (n, 0, 0)),
            scratch_shapes=[pltpu.VMEM((Mtot, K1), jnp.float32)],
        ),
        compiler_params=pltpu.CompilerParams(
            dimension_semantics=("parallel",)),
    )(xp, prepped["w1b"], prepped["b1t"], prepped["w2b"], prepped["b2t"])

    out = out.reshape(NB, G, H, P, W, Co).transpose(0, 1, 3, 2, 4, 5)
    out = out.reshape(N, H, W, Co)
    return jnp.transpose(out, (0, 3, 1, 2))                          # NCHW


# ----------------------------------------------------------------------------
# Pure-JAX reference (same semantics, HIGHEST precision) for validation.
# ----------------------------------------------------------------------------
def resblock_ref(x_nchw, params, eps=1e-5):
    x = jnp.transpose(x_nchw, (0, 2, 3, 1))
    dn = ("NHWC", "HWIO", "NHWC")

    def bn(y, g, b, m, v):
        return (y - m) / jnp.sqrt(v + eps) * g + b

    w1 = jnp.transpose(params["w1"], (2, 3, 1, 0))
    w2 = jnp.transpose(params["w2"], (2, 3, 1, 0))
    y = lax.conv_general_dilated(x, w1, (1, 1), "SAME", dimension_numbers=dn,
                                 precision=lax.Precision.HIGHEST)
    y = jnp.maximum(bn(y, params["g1"], params["b1"], params["m1"],
                       params["v1"]), 0.0)
    y = lax.conv_general_dilated(y, w2, (1, 1), "SAME", dimension_numbers=dn,
                                 precision=lax.Precision.HIGHEST)
    y = bn(y, params["g2"], params["b2"], params["m2"], params["v2"])
    out = jnp.maximum(y + x, 0.0)
    return jnp.transpose(out, (0, 3, 1, 2))


if __name__ == "__main__":
    # ResBlock(expansion=1, ni=4, nh=4, stride=1) -> ni = nh = nf = 4
    N, C, H, W = 2, 4, 16, 16
    nh = nf = 4

    key = jax.random.PRNGKey(0)
    ks = jax.random.split(key, 12)
    # NOTE: the module's __init__ would set bn1.gamma=1 and bn2.gamma=0
    # (zero_bn); deterministic random values are used so every fused op is
    # numerically exercised.  Shapes match the module exactly.
    params = {
        "w1": 0.1 * jax.random.normal(ks[0], (nh, C, 3, 3), jnp.float32),   # OIHW
        "g1": jax.random.uniform(ks[1], (nh,), jnp.float32, 0.5, 1.5),
        "b1": 0.1 * jax.random.normal(ks[2], (nh,), jnp.float32),
        "m1": 0.1 * jax.random.normal(ks[3], (nh,), jnp.float32),
        "v1": jax.random.uniform(ks[4], (nh,), jnp.float32, 0.5, 1.5),
        "w2": 0.1 * jax.random.normal(ks[5], (nf, nh, 3, 3), jnp.float32),  # OIHW
        "g2": jax.random.uniform(ks[6], (nf,), jnp.float32, 0.5, 1.5),
        "b2": 0.1 * jax.random.normal(ks[7], (nf,), jnp.float32),
        "m2": 0.1 * jax.random.normal(ks[8], (nf,), jnp.float32),
        "v2": jax.random.uniform(ks[9], (nf,), jnp.float32, 0.5, 1.5),
    }
    x = jax.random.normal(ks[10], (N, C, H, W), jnp.float32)

    # One-time weight prep (cache per weight set); the per-call path is just
    # layout packing + the fused kernel.
    prepped = prepare_resblock(params, W=W, pack=2)
    fwd = jax.jit(functools.partial(resblock_forward, pack=2))

    out = jax.block_until_ready(fwd(x, prepped))
    ref = jax.block_until_ready(resblock_ref(x, params))
    assert out.shape == (N, nf, H, W) and out.dtype == jnp.float32
    # bf16-operand MXU passes vs. HIGHEST-precision f32 reference: widened,
    # but still structural-bug-catching, tolerance (documented trade-off).
    assert jnp.allclose(out, ref, atol=2e-2, rtol=2e-2), (
        f"max abs err {jnp.max(jnp.abs(out - ref))}")

    # Larger batch: exercises multi-pair vertical stacking (G > 1), the
    # junk-row masking, and a >= 2-step "parallel" grid (v7x's 2nd TensorCore).
    # Identical numerics to the check above; atol is slightly wider only
    # because the max runs over 16x more samples.
    xb = jax.random.normal(ks[11], (16, C, H, W), jnp.float32)
    outb = jax.block_until_ready(fwd(xb, prepped))
    refb = jax.block_until_ready(resblock_ref(xb, params))
    assert outb.shape == (16, nf, H, W)
    assert jnp.allclose(outb, refb, atol=3e-2, rtol=2e-2), (
        f"max abs err {jnp.max(jnp.abs(outb - refb))}")

    print("KERNEL_OK")
</pallas_src>

<mosaic_0001>
module attributes {stable_mosaic.version = 11 : i64} {
  func.func @resblock_kernel(%arg0: i32, %arg1: memref<1x18x128xf32, #tpu.memory_space<vmem>>, %arg2: memref<3x128x128xbf16, #tpu.memory_space<vmem>>, %arg3: memref<1x128xf32, #tpu.memory_space<vmem>>, %arg4: memref<3x128x128xbf16, #tpu.memory_space<vmem>>, %arg5: memref<1x128xf32, #tpu.memory_space<vmem>>, %arg6: memref<1x16x128xf32, #tpu.memory_space<vmem>>, %arg7: memref<18x128xf32, #tpu.memory_space<vmem>>) attributes {dimension_semantics = [#tpu.dimension_semantics<parallel>], iteration_bounds = array<i64: 1>, scalar_prefetch = 0 : i64, scratch_operands = 1 : i64, tpu.core_type = #tpu.core_type<tc>, window_params = [{transform_indices = @transform_0, window_bounds = array<i64: 1, 18, 128>}, {pipeline_mode = #tpu.pipeline_mode<synchronous>, transform_indices = @transform_1, window_bounds = array<i64: 3, 128, 128>}, {pipeline_mode = #tpu.pipeline_mode<synchronous>, transform_indices = @transform_2, window_bounds = array<i64: 1, 128>}, {pipeline_mode = #tpu.pipeline_mode<synchronous>, transform_indices = @transform_3, window_bounds = array<i64: 3, 128, 128>}, {pipeline_mode = #tpu.pipeline_mode<synchronous>, transform_indices = @transform_4, window_bounds = array<i64: 1, 128>}, {transform_indices = @transform_5, window_bounds = array<i64: 1, 16, 128>}]} {
    %c0 = arith.constant 0 : index
    %c0_0 = arith.constant 0 : index
    %c0_1 = arith.constant 0 : index
    %0 = vector.load %arg1[%c0, %c0_0, %c0_1] : memref<1x18x128xf32, #tpu.memory_space<vmem>>, vector<1x18x128xf32>
    %1 = vector.shape_cast %0 : vector<1x18x128xf32> to vector<18x128xf32>
    %2 = vector.extract_strided_slice %1 {offsets = [0, 0], sizes = [16, 128], strides = [1, 1]} : vector<18x128xf32> to vector<16x128xf32>
    %3 = arith.truncf %2 : vector<16x128xf32> to vector<16x128xbf16>
    %c0_2 = arith.constant 0 : index
    %c0_3 = arith.constant 0 : index
    %c0_4 = arith.constant 0 : index
    %4 = vector.load %arg2[%c0_2, %c0_3, %c0_4] : memref<3x128x128xbf16, #tpu.memory_space<vmem>>, vector<1x128x128xbf16>
    %5 = vector.shape_cast %4 : vector<1x128x128xbf16> to vector<128x128xbf16>
    %cst = arith.constant dense<0.000000e+00> : vector<16x128xf32>
    %6 = tpu.matmul %3, %5, %cst {dimension_numbers = #tpu.dot_dimension_numbers<[1], [0], [0], [1], [0, 0, 1, 1], [], []>} : vector<16x128xbf16>, vector<128x128xbf16>, vector<16x128xf32> -> vector<16x128xf32>
    %7 = vector.extract_strided_slice %1 {offsets = [1, 0], sizes = [16, 128], strides = [1, 1]} : vector<18x128xf32> to vector<16x128xf32>
    %8 = arith.truncf %7 : vector<16x128xf32> to vector<16x128xbf16>
    %c1 = arith.constant 1 : index
    %c0_5 = arith.constant 0 : index
    %c0_6 = arith.constant 0 : index
    %9 = vector.load %arg2[%c1, %c0_5, %c0_6] : memref<3x128x128xbf16, #tpu.memory_space<vmem>>, vector<1x128x128xbf16>
    %10 = vector.shape_cast %9 : vector<1x128x128xbf16> to vector<128x128xbf16>
    %cst_7 = arith.constant dense<0.000000e+00> : vector<16x128xf32>
    %11 = tpu.matmul %8, %10, %cst_7 {dimension_numbers = #tpu.dot_dimension_numbers<[1], [0], [0], [1], [0, 0, 1, 1], [], []>} : vector<16x128xbf16>, vector<128x128xbf16>, vector<16x128xf32> -> vector<16x128xf32>
    %12 = arith.addf %6, %11 : vector<16x128xf32>
    %13 = vector.extract_strided_slice %1 {offsets = [2, 0], sizes = [16, 128], strides = [1, 1]} : vector<18x128xf32> to vector<16x128xf32>
    %14 = arith.truncf %13 : vector<16x128xf32> to vector<16x128xbf16>
    %c2 = arith.constant 2 : index
    %c0_8 = arith.constant 0 : index
    %c0_9 = arith.constant 0 : index
    %15 = vector.load %arg2[%c2, %c0_8, %c0_9] : memref<3x128x128xbf16, #tpu.memory_space<vmem>>, vector<1x128x128xbf16>
    %16 = vector.shape_cast %15 : vector<1x128x128xbf16> to vector<128x128xbf16>
    %cst_10 = arith.constant dense<0.000000e+00> : vector<16x128xf32>
    %17 = tpu.matmul %14, %16, %cst_10 {dimension_numbers = #tpu.dot_dimension_numbers<[1], [0], [0], [1], [0, 0, 1, 1], [], []>} : vector<16x128xbf16>, vector<128x128xbf16>, vector<16x128xf32> -> vector<16x128xf32>
    %18 = arith.addf %12, %17 : vector<16x128xf32>
    %c0_11 = arith.constant 0 : index
    %c0_12 = arith.constant 0 : index
    %19 = vector.load %arg3[%c0_11, %c0_12] : memref<1x128xf32, #tpu.memory_space<vmem>>, vector<1x128xf32>
    %20 = vector.broadcast %19 : vector<1x128xf32> to vector<16x128xf32>
    %21 = arith.addf %18, %20 : vector<16x128xf32>
    %cst_13 = arith.constant 0.000000e+00 : f32
    %22 = vector.broadcast %cst_13 : f32 to vector<16x128xf32>
    %23 = arith.maximumf %21, %22 : vector<16x128xf32>
    %cst_14 = arith.constant 0.000000e+00 : f32
    %24 = vector.broadcast %cst_14 : f32 to vector<1x128xf32>
    %c0_15 = arith.constant 0 : index
    %c0_16 = arith.constant 0 : index
    %25 = vector.load %arg7[%c0_15, %c0_16] : memref<18x128xf32, #tpu.memory_space<vmem>>, vector<1x128xf32>
    tpu.vector_store %arg7[%c0_15, %c0_16], %24 {strides = array<i32>} : memref<18x128xf32, #tpu.memory_space<vmem>>, vector<1x128xf32>,
    %c17 = arith.constant 17 : index
    %c0_17 = arith.constant 0 : index
    %26 = vector.load %arg7[%c17, %c0_17] : memref<18x128xf32, #tpu.memory_space<vmem>>, vector<1x128xf32>
    tpu.vector_store %arg7[%c17, %c0_17], %24 {strides = array<i32>} : memref<18x128xf32, #tpu.memory_space<vmem>>, vector<1x128xf32>,
    %c1_18 = arith.constant 1 : index
    %c0_19 = arith.constant 0 : index
    %27 = vector.load %arg7[%c1_18, %c0_19] : memref<18x128xf32, #tpu.memory_space<vmem>>, vector<16x128xf32>
    tpu.vector_store %arg7[%c1_18, %c0_19], %23 {strides = array<i32>} : memref<18x128xf32, #tpu.memory_space<vmem>>, vector<16x128xf32>,
    %c0_20 = arith.constant 0 : index
    %c0_21 = arith.constant 0 : index
    %28 = vector.load %arg7[%c0_20, %c0_21] : memref<18x128xf32, #tpu.memory_space<vmem>>, vector<16x128xf32>
    %29 = arith.truncf %28 : vector<16x128xf32> to vector<16x128xbf16>
    %c0_22 = arith.constant 0 : index
    %c0_23 = arith.constant 0 : index
    %c0_24 = arith.constant 0 : index
    %30 = vector.load %arg4[%c0_22, %c0_23, %c0_24] : memref<3x128x128xbf16, #tpu.memory_space<vmem>>, vector<1x128x128xbf16>
    %31 = vector.shape_cast %30 : vector<1x128x128xbf16> to vector<128x128xbf16>
    %cst_25 = arith.constant dense<0.000000e+00> : vector<16x128xf32>
    %32 = tpu.matmul %29, %31, %cst_25 {dimension_numbers = #tpu.dot_dimension_numbers<[1], [0], [0], [1], [0, 0, 1, 1], [], []>} : vector<16x128xbf16>, vector<128x128xbf16>, vector<16x128xf32> -> vector<16x128xf32>
    %c1_26 = arith.constant 1 : index
    %c0_27 = arith.constant 0 : index
    %33 = vector.load %arg7[%c1_26, %c0_27] : memref<18x128xf32, #tpu.memory_space<vmem>>, vector<16x128xf32>
    %34 = arith.truncf %33 : vector<16x128xf32> to vector<16x128xbf16>
    %c1_28 = arith.constant 1 : index
    %c0_29 = arith.constant 0 : index
    %c0_30 = arith.constant 0 : index
    %35 = vector.load %arg4[%c1_28, %c0_29, %c0_30] : memref<3x128x128xbf16, #tpu.memory_space<vmem>>, vector<1x128x128xbf16>
    %36 = vector.shape_cast %35 : vector<1x128x128xbf16> to vector<128x128xbf16>
    %cst_31 = arith.constant dense<0.000000e+00> : vector<16x128xf32>
    %37 = tpu.matmul %34, %36, %cst_31 {dimension_numbers = #tpu.dot_dimension_numbers<[1], [0], [0], [1], [0, 0, 1, 1], [], []>} : vector<16x128xbf16>, vector<128x128xbf16>, vector<16x128xf32> -> vector<16x128xf32>
    %38 = arith.addf %32, %37 : vector<16x128xf32>
    %c2_32 = arith.constant 2 : index
    %c0_33 = arith.constant 0 : index
    %39 = vector.load %arg7[%c2_32, %c0_33] : memref<18x128xf32, #tpu.memory_space<vmem>>, vector<16x128xf32>
    %40 = arith.truncf %39 : vector<16x128xf32> to vector<16x128xbf16>
    %c2_34 = arith.constant 2 : index
    %c0_35 = arith.constant 0 : index
    %c0_36 = arith.constant 0 : index
    %41 = vector.load %arg4[%c2_34, %c0_35, %c0_36] : memref<3x128x128xbf16, #tpu.memory_space<vmem>>, vector<1x128x128xbf16>
    %42 = vector.shape_cast %41 : vector<1x128x128xbf16> to vector<128x128xbf16>
    %cst_37 = arith.constant dense<0.000000e+00> : vector<16x128xf32>
    %43 = tpu.matmul %40, %42, %cst_37 {dimension_numbers = #tpu.dot_dimension_numbers<[1], [0], [0], [1], [0, 0, 1, 1], [], []>} : vector<16x128xbf16>, vector<128x128xbf16>, vector<16x128xf32> -> vector<16x128xf32>
    %44 = arith.addf %38, %43 : vector<16x128xf32>
    %c0_38 = arith.constant 0 : index
    %c0_39 = arith.constant 0 : index
    %45 = vector.load %arg5[%c0_38, %c0_39] : memref<1x128xf32, #tpu.memory_space<vmem>>, vector<1x128xf32>
    %46 = vector.broadcast %45 : vector<1x128xf32> to vector<16x128xf32>
    %47 = arith.addf %44, %46 : vector<16x128xf32>
    %48 = vector.extract_strided_slice %1 {offsets = [1, 0], sizes = [16, 128], strides = [1, 1]} : vector<18x128xf32> to vector<16x128xf32>
    %49 = arith.addf %47, %48 : vector<16x128xf32>
    %cst_40 = arith.constant 0.000000e+00 : f32
    %50 = vector.broadcast %cst_40 : f32 to vector<16x128xf32>
    %51 = arith.maximumf %49, %50 : vector<16x128xf32>
    %c0_41 = arith.constant 0 : index
    %c0_42 = arith.constant 0 : index
    %c0_43 = arith.constant 0 : index
    %52 = vector.load %arg6[%c0_41, %c0_42, %c0_43] : memref<1x16x128xf32, #tpu.memory_space<vmem>>, vector<1x16x128xf32>
    %53 = vector.shape_cast %52 : vector<1x16x128xf32> to vector<16x128xf32>
    %54 = vector.shape_cast %51 : vector<16x128xf32> to vector<1x16x128xf32>
    tpu.vector_store %arg6[%c0_41, %c0_42, %c0_43], %54 {strides = array<i32>} : memref<1x16x128xf32, #tpu.memory_space<vmem>>, vector<1x16x128xf32>,
    return
  }
  func.func @transform_0(%arg0: i32) -> (i32, i32, i32) {
    %c0_i32 = arith.constant 0 : i32
    %c0_i32_0 = arith.constant 0 : i32
    %c0_i32_1 = arith.constant 0 : i32
    return %arg0, %c0_i32, %c0_i32_0 : i32, i32, i32
  }
  func.func @transform_1(%arg0: i32) -> (i32, i32, i32) {
    %c0_i32 = arith.constant 0 : i32
    %c0_i32_0 = arith.constant 0 : i32
    %c0_i32_1 = arith.constant 0 : i32
    %c0_i32_2 = arith.constant 0 : i32
    return %c0_i32, %c0_i32_0, %c0_i32_1 : i32, i32, i32
  }
  func.func @transform_2(%arg0: i32) -> (i32, i32) {
    %c0_i32 = arith.constant 0 : i32
    %c0_i32_0 = arith.constant 0 : i32
    %c0_i32_1 = arith.constant 0 : i32
    return %c0_i32, %c0_i32_0 : i32, i32
  }
  func.func @transform_3(%arg0: i32) -> (i32, i32, i32) {
    %c0_i32 = arith.constant 0 : i32
    %c0_i32_0 = arith.constant 0 : i32
    %c0_i32_1 = arith.constant 0 : i32
    %c0_i32_2 = arith.constant 0 : i32
    return %c0_i32, %c0_i32_0, %c0_i32_1 : i32, i32, i32
  }
  func.func @transform_4(%arg0: i32) -> (i32, i32) {
    %c0_i32 = arith.constant 0 : i32
    %c0_i32_0 = arith.constant 0 : i32
    %c0_i32_1 = arith.constant 0 : i32
    return %c0_i32, %c0_i32_0 : i32, i32
  }
  func.func @transform_5(%arg0: i32) -> (i32, i32, i32) {
    %c0_i32 = arith.constant 0 : i32
    %c0_i32_0 = arith.constant 0 : i32
    %c0_i32_1 = arith.constant 0 : i32
    return %arg0, %c0_i32, %c0_i32_0 : i32, i32, i32
  }
}

</mosaic_0001>

<bundles_post_ra>
// kernel: resblock_forward.1
= control target key start
LH: loop header
LB: loop body
LE: loop exit
PB: predicated region body
PF: predicated region fallthrough
CT: control target
= control target key end

     0   :  { %vm215_vm0 = vcmask 1046528   ;;  %vm58_vm1 = vsmask.f32 7424  ;;  %v877_v58 = vmov 0.0   ;;  %s1082_s1 = inlined_call_operand.vmem [shape: bf16[3,128,128], index: 1, kind: input, shape index: {}]   ;;  %s1083_s0 = inlined_call_operand.vmem [shape: f32[1,18,128], index: 0, kind: input, shape index: {}]   ;;  %s1084_s2 = inlined_call_operand.vmem [shape: f32[1,128], index: 2, kind: input, shape index: {}]   ;;  %s1085_s3 = inlined_call_operand.vmem [shape: bf16[3,128,128], index: 3, kind: input, shape index: {}]   ;;  %s1086_s4 = inlined_call_operand.vmem [shape: f32[1,128], index: 4, kind: input, shape index: {}]   ;;  %s1087_s5 = inlined_call_operand.vmem [shape: f32[1,16,128], index: 5, kind: output, shape index: {}]  }
   0x1   :  { %v841_v0 = vld [vmem:[%s1082_s1 + $0x78] sm:$0xff]  ;;  %v840_v3 = vld [vmem:[%s1082_s1 + $0x70] sm:$0xff]  ;;  %v839_v6 = vld [vmem:[%s1082_s1 + $0x68] sm:$0xff]  ;;  %292 = vst [vmem:[#allocation2] sm:$0x1] %v877_v58 }
   0x2   :  { %v833_v1 = vld [vmem:[%s1082_s1 + $0x38] sm:$0xff]  ;;  %120 = vmatpush.bf16.msra.mxu0 %v841_v0  ;;  %v832_v4 = vld [vmem:[%s1082_s1 + $0x30] sm:$0xff]  ;;  %v831_v7 = vld [vmem:[%s1082_s1 + $0x28] sm:$0xff]  ;;  %293 = vst [vmem:[#allocation2 + $0x11] sm:$0x1] %v877_v58 }
   0x3   :  { %v849_v2 = vld [vmem:[%s1082_s1 + $0xb8] sm:$0xff]  ;;  %182 = vmatpush.bf16.msra.mxu1 %v833_v1  ;;  %v848_v5 = vld [vmem:[%s1082_s1 + $0xb0] sm:$0xff]  ;;  %v847_v8 = vld [vmem:[%s1082_s1 + $0xa8] sm:$0xff] }
   0x4   :  { %268 = vmatpush.bf16.msra.mxu2 %v849_v2  ;;  %v20_v9 = vld [vmem:[%s1083_s0] sm:$0xff]  ;;  %v21_v10 = vld [vmem:[%s1083_s0 + $0x8] sm:$0xff]  ;;  %v22_v11 = vld [vmem:[%s1083_s0 + $0x10] sm:$0x3] }
   0x5   :  { %v553_v12 = vrot.slane %v20_v9, 1  ;;  %v554_v13 = vrot.slane %v21_v10, 1  ;;  %v838_v14 = vld [vmem:[%s1082_s1 + $0x60] sm:$0xff]  ;;  %v556_v16 = vrot.slane %v22_v11, 1  ;;  %v837_v20 = vld [vmem:[%s1082_s1 + $0x58] sm:$0xff]  ;;  %v23_v22 = vpack.c.bf16 %v21_v10, %v20_v9  ;;  %v836_v24 = vld [vmem:[%s1082_s1 + $0x50] sm:$0xff] }
   0x6   :  { %121 = vmatpush.bf16.msra.mxu0 %v840_v3  ;;  %v830_v15 = vld [vmem:[%s1082_s1 + $0x20] sm:$0xff]  ;;  %v829_v21 = vld [vmem:[%s1082_s1 + $0x18] sm:$0xff]  ;;  %v828_v25 = vld [vmem:[%s1082_s1 + $0x10] sm:$0xff]  ;;  %v40_v26 = vpack.c.bf16 %v22_v11, %v22_v11 }
   0x7   :  { %183 = vmatpush.bf16.msra.mxu1 %v832_v4  ;;  %v846_v17 = vld [vmem:[%s1082_s1 + $0xa0] sm:$0xff]  ;;  %v954_v18 = vsel %vm215_vm0, %v553_v12, %v554_v13  ;;  %v957_v19 = vsel %vm215_vm0, %v554_v13, %v556_v16  ;;  %v845_v23 = vld [vmem:[%s1082_s1 + $0x98] sm:$0xff]  ;;  %v62_v27 = vshll.u32 %v23_v22, 16  ;;  %v844_v28 = vld [vmem:[%s1082_s1 + $0x90] sm:$0xff]  ;;  %v60_v31 = vshrl.u32 %v23_v22, 16 }
   0x8   :  { %269 = vmatpush.bf16.msra.mxu2 %v848_v5  ;;  %v835_v29 = vld [vmem:[%s1082_s1 + $0x48] sm:$0xff]  ;;  %v67_v33 = vshll.u32 %v40_v26, 16  ;;  %v834_v35 = vld [vmem:[%s1082_s1 + $0x40] sm:$0xff]  ;;  %v216_v40 = vrot.slane %v23_v22, 1  ;;  %v217_v41 = vrot.slane %v40_v26, 1  ;;  %v865_v44 = vld [vmem:[%s1085_s3 + $0x78] sm:$0xff] }
   0x9   :  { %v827_v30 = vld [vmem:[%s1082_s1 + $0x8] sm:$0xff]  ;;  %v64_v32 = vrot.slane %v62_v27, 1  ;;  %v826_v36 = vld [vmem:[%s1082_s1] sm:$0xff]  ;;  %383 = vmatpush.bf16.msra.mxu3 %v865_v44  ;;  %v864_v45 = vld [vmem:[%s1085_s3 + $0x70] sm:$0xff] }
   0xa   :  { %122 = vmatpush.bf16.msra.mxu0 %v839_v6  ;;  %v843_v34 = vld [vmem:[%s1082_s1 + $0x88] sm:$0xff]  ;;  %v69_v38 = vrot.slane %v67_v33, 1  ;;  %v842_v39 = vld [vmem:[%s1082_s1 + $0x80] sm:$0xff]  ;;  %v218_v43 = vsel %vm215_vm0, %v216_v40, %v217_v41  ;;  %v857_v46 = vld [vmem:[%s1085_s3 + $0x38] sm:$0xff] }
   0xb   :  { %184 = vmatpush.bf16.msra.mxu1 %v831_v7  ;;  %v65_v37 = vor.u32 %v64_v32, %v60_v31  ;;  %v873_v47 = vld [vmem:[%s1085_s3 + $0xb8] sm:$0xff]  ;;  %v863_v48 = vld [vmem:[%s1085_s3 + $0x68] sm:$0xff]  ;;  %v856_v49 = vld [vmem:[%s1085_s3 + $0x30] sm:$0xff] }
   0xc   :  { %270 = vmatpush.bf16.msra.mxu2 %v847_v8  ;;  %v872_v50 = vld [vmem:[%s1085_s3 + $0xb0] sm:$0xff]  ;;  %v862_v51 = vld [vmem:[%s1085_s3 + $0x60] sm:$0xff]  ;;  %v855_v52 = vld [vmem:[%s1085_s3 + $0x28] sm:$0xff] }
   0xd   :  { %v70_v42 = vsel %vm58_vm1, %v65_v37, %v69_v38  ;;  %384 = vmatpush.bf16.msra.mxu3 %v864_v45  ;;  %v871_v53 = vld [vmem:[%s1085_s3 + $0xa8] sm:$0xff]  ;;  %v861_v54 = vld [vmem:[%s1085_s3 + $0x58] sm:$0xff]  ;;  %v854_v55 = vld [vmem:[%s1085_s3 + $0x20] sm:$0xff] }
   0xe   :  { %123 = vmatpush.bf16.msra.mxu0 %v838_v14  ;;  %v870_v56 = vld [vmem:[%s1085_s3 + $0xa0] sm:$0xff]  ;;  %v860_v57 = vld [vmem:[%s1085_s3 + $0x50] sm:$0xff]  ;;  %v853_v59 = vld [vmem:[%s1085_s3 + $0x18] sm:$0xff] }
   0xf   :  { %185 = vmatpush.bf16.msra.mxu1 %v830_v15  ;;  %v869_v60 = vld [vmem:[%s1085_s3 + $0x98] sm:$0xff]  ;;  %v859_v61 = vld [vmem:[%s1085_s3 + $0x48] sm:$0xff]  ;;  %v852_v62 = vld [vmem:[%s1085_s3 + $0x10] sm:$0xff] }
  0x10   :  { %271 = vmatpush.bf16.msra.mxu2 %v846_v17  ;;  %v868_v63 = vld [vmem:[%s1085_s3 + $0x90] sm:$0xff]  ;;  %v858_v0 = vld [vmem:[%s1085_s3 + $0x40] sm:$0xff]  ;;  %v851_v1 = vld [vmem:[%s1085_s3 + $0x8] sm:$0xff] }
  0x11   :  { %385 = vmatpush.bf16.msra.mxu3 %v863_v48  ;;  %v867_v2 = vld [vmem:[%s1085_s3 + $0x88] sm:$0xff]  ;;  %v850_v3 = vld [vmem:[%s1085_s3] sm:$0xff] }
  0x12   :  { %124 = vmatpush.bf16.msra.mxu0 %v837_v20  ;;  %v866_v4 = vld [vmem:[%s1085_s3 + $0x80] sm:$0xff] }
  0x13   :  { %186 = vmatpush.bf16.msra.mxu1 %v829_v21  ;;  %v875_v8 = vld [vmem:[%s1084_s2] ss:$0 sm:$0xff] }
  0x14   :  { %272 = vmatpush.bf16.msra.mxu2 %v845_v23  ;;  %v876_v33 = vld [vmem:[%s1086_s4] ss:$0 sm:$0xff] }
  0x15   :  { %386 = vmatpush.bf16.msra.mxu3 %v862_v51 }
  0x16   :  { %125 = vmatpush.bf16.msra.mxu0 %v836_v24 }
  0x17   :  { %187 = vmatpush.bf16.msra.mxu1 %v828_v25 }
  0x18   :  { %273 = vmatpush.bf16.msra.mxu2 %v844_v28 }
  0x19   :  { %387 = vmatpush.bf16.msra.mxu3 %v861_v54 }
  0x1a   :  { %126 = vmatpush.bf16.msra.mxu0 %v835_v29 }
  0x1b   :  { %188 = vmatpush.bf16.msra.mxu1 %v827_v30 }
  0x1c   :  { %274 = vmatpush.bf16.msra.mxu2 %v843_v34 }
  0x1d   :  { %388 = vmatpush.bf16.msra.mxu3 %v860_v57 }
  0x1e   :  { %127 = vmatpush.bf16.msra.mxu0 %v834_v35 }
  0x1f   :  { %189 = vmatpush.bf16.msra.mxu1 %v826_v36 }
  0x20   :  { %275 = vmatpush.bf16.msra.mxu2 %v842_v39 }
  0x21   :  { %128 = vmatmul.bf16.vlgmr.msra.gmra.mxu0 %v70_v42  ;;  %389 = vmatpush.bf16.msra.mxu3 %v859_v61 }
  0x22   :  { %190 = vmatmul.bf16.vlgmr.msra.gmra.mxu1 %v23_v22  ;;  %445 = vmatpush.bf16.msrb.mxu0 %v857_v46 }
  0x23   :  { %276 = vmatmul.bf16.vlgmr.msra.gmra.mxu2 %v218_v43  ;;  %527 = vmatpush.bf16.msrb.mxu1 %v873_v47 }
  0x25   :  { %390 = vmatpush.bf16.msra.mxu3 %v858_v0 }
  0x26   :  { %446 = vmatpush.bf16.msrb.mxu0 %v856_v49 }
  0x27   :  { %528 = vmatpush.bf16.msrb.mxu1 %v872_v50 }
  0x2a   :  { %447 = vmatpush.bf16.msrb.mxu0 %v855_v52 }
  0x2b   :  { %529 = vmatpush.bf16.msrb.mxu1 %v871_v53 }
  0x2e   :  { %448 = vmatpush.bf16.msrb.mxu0 %v854_v55 }
  0x2f   :  { %530 = vmatpush.bf16.msrb.mxu1 %v870_v56 }
  0x32   :  { %449 = vmatpush.bf16.msrb.mxu0 %v853_v59 }
  0x33   :  { %531 = vmatpush.bf16.msrb.mxu1 %v869_v60 }
  0x36   :  { %450 = vmatpush.bf16.msrb.mxu0 %v852_v62 }
  0x37   :  { %532 = vmatpush.bf16.msrb.mxu1 %v868_v63 }
  0x3a   :  { %451 = vmatpush.bf16.msrb.mxu0 %v851_v1 }
  0x3b   :  { %533 = vmatpush.bf16.msrb.mxu1 %v867_v2 }
  0x3e   :  { %452 = vmatpush.bf16.msrb.mxu0 %v850_v3 }
  0x3f   :  { %534 = vmatpush.bf16.msrb.mxu1 %v866_v4 }
  0x9e   :  { %v129_v5 = vpop.f32.mrf.mxu0 }
  0x9f   :  { %v191_v6 = vpop.f32.mrf.mxu1 }
  0xa0   :  { %v192_v7 = vadd.f32 %v191_v6, %v129_v5 }
  0xa6   :  { %v277_v9 = vpop.f32.mrf.mxu2  ;;  %v131_v12 = vpop.f32.mrf.mxu0 }
  0xa7   :  { %v282_v10 = vadd.f32 %v277_v9, %v192_v7  ;;  %v193_v13 = vpop.f32.mrf.mxu1 }
  0xa8   :  { %v194_v15 = vadd.f32 %v193_v13, %v131_v12 }
  0xa9   :  { %v288_v11 = vadd.f32 %v875_v8, %v282_v10 }
  0xab   :  { %v290_v14 = vmax.f32 %v288_v11, 0.0 }
  0xad   :  { %294 = vst [vmem:[#allocation2 + $0x1] sm:$0xff] %v290_v14 }
  0xae   :  { %v279_v16 = vpop.f32.mrf.mxu2 }
  0xaf   :  { %v283_v17 = vadd.f32 %v279_v16, %v194_v15 }
  0xb1   :  { %v289_v20 = vadd.f32 %v875_v8, %v283_v17 }
  0xb3   :  { %v291_v21 = vmax.f32 %v289_v20, 0.0 }
  0xb4   :  { %v296_v23 = vld [vmem:[#allocation2] sm:$0xff] }
  0xb5   :  { %295 = vst [vmem:[#allocation2 + $0x9] sm:$0xff] %v291_v21  ;;  %v317_v22 = vpack.c.bf16 %v291_v21, %v290_v14 }
  0xb7   :  { %391 = vmatmul.bf16.vlgmr.msra.gmra.mxu3 %v317_v22 }
  0xbc   :  { %v297_v24 = vld [vmem:[#allocation2 + $0x8] sm:$0xff] }
  0xbd   :  { %v459_v25 = vld [vmem:[#allocation2 + $0x2] sm:$0xff]  ;;  %v460_v26 = vld [vmem:[#allocation2 + $0xa] sm:$0xff]  ;;  %v298_v27 = vpack.c.bf16 %v297_v24, %v296_v23 }
  0xbe   :  { %v461_v28 = vpack.c.bf16 %v460_v26, %v459_v25 }
  0xbf   :  { %453 = vmatmul.bf16.vlgmr.msrb.gmra.mxu0 %v298_v27 }
  0xc0   :  { %535 = vmatmul.bf16.vlgmr.msrb.gmra.mxu1 %v461_v28 }
 0x13a   :  { %v392_v29 = vpop.f32.mrf.mxu3 }
 0x13c   :  { %v454_v30 = vpop.f32.mrf.mxu0 }
 0x13d   :  { %v536_v31 = vpop.f32.mrf.mxu1  ;;  %v455_v32 = vadd.f32 %v454_v30, %v392_v29 }
 0x13f   :  { %v541_v34 = vadd.f32 %v536_v31, %v455_v32 }
 0x141   :  { %v547_v35 = vadd.f32 %v876_v33, %v541_v34 }
 0x142   :  { %v394_v38 = vpop.f32.mrf.mxu3 }
 0x143   :  { %v560_v36 = vadd.f32 %v954_v18, %v547_v35 }
 0x144   :  { %v456_v37 = vpop.f32.mrf.mxu0 }
 0x145   :  { %v562_v39 = vmax.f32 %v560_v36, 0.0  ;;  %v457_v40 = vadd.f32 %v456_v37, %v394_v38  ;;  %v538_v41 = vpop.f32.mrf.mxu1 }
 0x147   :  { %564 = vst [vmem:[%s1087_s5] sm:$0xff] %v562_v39  ;;  %v542_v42 = vadd.f32 %v538_v41, %v457_v40 }
 0x149   :  { %v548_v43 = vadd.f32 %v876_v33, %v542_v42 }
 0x14b   :  { %v561_v44 = vadd.f32 %v957_v19, %v548_v43 }
 0x14d   :  { %v563_v45 = vmax.f32 %v561_v44, 0.0 }
 0x14f   :  { %565 = vst [vmem:[%s1087_s5 + $0x8] sm:$0xff] %v563_v45 }

</bundles_post_ra>
